<compile_context>
chip_gen: v6e
topology: v6e:2x2x1
jax: 0.10.0
libtpu: 0.0.40
codegen_flags: <defaults>
</compile_context>

<pallas_src>
import jax
import jax.numpy as jnp
from jax.experimental import pallas as pl
from jax.experimental.pallas import tpu as pltpu


def _make_kernel(B, S, E):
    def _concat_kernel(idx_ref, cur_ref, enc_ref, out_ref):
        # idx_ref : (N*2*B,) int32 in SMEM (scalar prefetch),
        #           layout [node, {parent, sibling}, batch]
        # cur_ref : (B, E)      current-node rows for this node (node axis squeezed)
        # enc_ref : (B, S, E)   encoded_input slab, resident in VMEM
        # out_ref : (B, 3*E)    output rows for this node (node axis squeezed)
        n = pl.program_id(0)
        base = n * (2 * B)

        # Segment 0: current node -> one lane-aligned full-width slice store.
        out_ref[:, 0:E] = cur_ref[...]

        # Segments 1 & 2: per-batch-row gathers from encoded_input.
        # B is tiny & static -> unrolled scalar-indexed dynamic slices, stored
        # straight into their lane-aligned destination (no concatenates).
        for b in range(B):
            p = jnp.minimum(jnp.maximum(idx_ref[base + b], 0), S - 1)
            s = jnp.minimum(jnp.maximum(idx_ref[base + B + b], 0), S - 1)
            out_ref[pl.ds(b, 1), pl.ds(E, E)] = enc_ref[b, pl.ds(p, 1), :]
            out_ref[pl.ds(b, 1), pl.ds(2 * E, E)] = enc_ref[b, pl.ds(s, 1), :]

    return _concat_kernel


def plain_concat_context_provider(current_node, encoded_input, parent_idx, sibling_idx):
    N, B, E = current_node.shape
    Be, S, Ee = encoded_input.shape
    assert (Be, Ee) == (B, E), "encoded_input must be (B, S, E) matching current_node"
    assert parent_idx.shape == (N, B) and sibling_idx.shape == (N, B), "indices must be (N, B)"
    assert current_node.dtype == encoded_input.dtype, "dtype mismatch"
    out_dim = 3 * E

    # Single merged scalar-prefetch operand: [n, {parent, sibling}, b] flattened.
    idx = jnp.stack(
        [parent_idx.astype(jnp.int32), sibling_idx.astype(jnp.int32)], axis=1
    ).reshape(-1)

    grid_spec = pltpu.PrefetchScalarGridSpec(
        num_scalar_prefetch=1,                 # merged index table -> SMEM
        grid=(N,),                             # one grid step per node / decode step
        in_specs=[
            # current_node: one node-row per step (node axis squeezed away).
            pl.BlockSpec((pl.Squeezed(), B, E), lambda n, idx_ref: (n, 0, 0)),
            # encoded_input: constant block index -> fetched once, stays resident.
            pl.BlockSpec((B, S, E), lambda n, idx_ref: (0, 0, 0)),
        ],
        out_specs=pl.BlockSpec((pl.Squeezed(), B, out_dim), lambda n, idx_ref: (n, 0, 0)),
    )

    itemsize = jnp.dtype(current_node.dtype).itemsize
    cost = pl.CostEstimate(
        flops=0,
        transcendentals=0,
        bytes_accessed=(N * B * E + B * S * E + N * B * out_dim) * itemsize + idx.size * 4,
    )

    return pl.pallas_call(
        _make_kernel(B, S, E),
        out_shape=jax.ShapeDtypeStruct((N, B, out_dim), current_node.dtype),
        grid_spec=grid_spec,
        compiler_params=pltpu.CompilerParams(
            dimension_semantics=("parallel",)),   # lets v7x megacore split the node axis
        cost_estimate=cost,
    )(idx, current_node, encoded_input)


def reference(current_node, encoded_input, parent_idx, sibling_idx):
    # Pure-JAX semantic reference of PlainConcatContextProver.forward applied
    # independently to each of the N nodes.
    N, B, E = current_node.shape
    S = encoded_input.shape[1]
    p = jnp.clip(parent_idx, 0, S - 1)
    s = jnp.clip(sibling_idx, 0, S - 1)
    barange = jnp.arange(B)
    parent = encoded_input[barange[None, :], p]     # (N, B, E)
    sibling = encoded_input[barange[None, :], s]    # (N, B, E)
    return jnp.concatenate([current_node, parent, sibling], axis=-1)


if __name__ == "__main__":
    N, B, S, E = 4, 2, 8, 128   # nodes/decode-steps, batch, input_seq_len, encoder dim

    key = jax.random.PRNGKey(0)
    k1, k2, k3, k4 = jax.random.split(key, 4)

    current_node = jax.random.normal(k1, (N, B, E), dtype=jnp.float32)
    encoded_input = jax.random.normal(k2, (B, S, E), dtype=jnp.float32)
    parent_idx = jax.random.randint(k3, (N, B), 0, S, dtype=jnp.int32)
    sibling_idx = jax.random.randint(k4, (N, B), 0, S, dtype=jnp.int32)

    out = plain_concat_context_provider(current_node, encoded_input,
                                        parent_idx, sibling_idx)
    out = jax.block_until_ready(out)

    ref = reference(current_node, encoded_input, parent_idx, sibling_idx)
    assert out.shape == (N, B, 3 * E), out.shape
    assert jnp.allclose(out, ref, atol=1e-6, rtol=1e-6), "mismatch vs reference"

    print("KERNEL_OK")
</pallas_src>

<mosaic_0001>
module attributes {stable_mosaic.version = 11 : i64} {
  func.func @_concat_kernel(%arg0: i32, %arg1: memref<16xi32, #tpu.memory_space<smem>>, %arg2: memref<1x2x128xf32, #tpu.memory_space<vmem>>, %arg3: memref<2x8x128xf32, #tpu.memory_space<vmem>>, %arg4: memref<1x2x384xf32, #tpu.memory_space<vmem>>) attributes {dimension_semantics = [#tpu.dimension_semantics<parallel>], iteration_bounds = array<i64: 4>, scalar_prefetch = 1 : i64, scratch_operands = 0 : i64, tpu.core_type = #tpu.core_type<tc>, window_params = [{transform_indices = @transform_0, window_bounds = array<i64: 1, 2, 128>}, {pipeline_mode = #tpu.pipeline_mode<synchronous>, transform_indices = @transform_1, window_bounds = array<i64: 2, 8, 128>}, {transform_indices = @transform_2, window_bounds = array<i64: 1, 2, 384>}]} {
    %c4_i32 = arith.constant 4 : i32
    %0 = arith.muli %arg0, %c4_i32 : i32
    %c0 = arith.constant 0 : index
    %c0_0 = arith.constant 0 : index
    %c0_1 = arith.constant 0 : index
    %1 = vector.load %arg2[%c0, %c0_0, %c0_1] : memref<1x2x128xf32, #tpu.memory_space<vmem>>, vector<1x2x128xf32>
    %2 = vector.shape_cast %1 : vector<1x2x128xf32> to vector<2x128xf32>
    %c0_2 = arith.constant 0 : index
    %c0_3 = arith.constant 0 : index
    %c0_4 = arith.constant 0 : index
    %3 = vector.load %arg4[%c0_2, %c0_3, %c0_4] : memref<1x2x384xf32, #tpu.memory_space<vmem>>, vector<1x2x128xf32>
    %4 = vector.shape_cast %3 : vector<1x2x128xf32> to vector<2x128xf32>
    %5 = vector.shape_cast %2 : vector<2x128xf32> to vector<1x2x128xf32>
    tpu.vector_store %arg4[%c0_2, %c0_3, %c0_4], %5 {strides = array<i32>} : memref<1x2x384xf32, #tpu.memory_space<vmem>>, vector<1x2x128xf32>,
    %c0_i32 = arith.constant 0 : i32
    %6 = arith.addi %0, %c0_i32 : i32
    %7 = arith.index_cast %6 : i32 to index
    %8 = memref.load %arg1[%7] : memref<16xi32, #tpu.memory_space<smem>>
    %c0_i32_5 = arith.constant 0 : i32
    %9 = arith.maxsi %8, %c0_i32_5 : i32
    %c7_i32 = arith.constant 7 : i32
    %10 = arith.minsi %9, %c7_i32 : i32
    %c2_i32 = arith.constant 2 : i32
    %11 = arith.addi %0, %c2_i32 : i32
    %c0_i32_6 = arith.constant 0 : i32
    %12 = arith.addi %11, %c0_i32_6 : i32
    %13 = arith.index_cast %12 : i32 to index
    %14 = memref.load %arg1[%13] : memref<16xi32, #tpu.memory_space<smem>>
    %c0_i32_7 = arith.constant 0 : i32
    %15 = arith.maxsi %14, %c0_i32_7 : i32
    %c7_i32_8 = arith.constant 7 : i32
    %16 = arith.minsi %15, %c7_i32_8 : i32
    %c0_9 = arith.constant 0 : index
    %17 = arith.index_cast %10 : i32 to index
    %c0_10 = arith.constant 0 : index
    %18 = vector.load %arg3[%c0_9, %17, %c0_10] : memref<2x8x128xf32, #tpu.memory_space<vmem>>, vector<1x1x128xf32>
    %19 = vector.shape_cast %18 : vector<1x1x128xf32> to vector<1x128xf32>
    %c0_11 = arith.constant 0 : index
    %c0_12 = arith.constant 0 : index
    %c128 = arith.constant 128 : index
    %20 = vector.load %arg4[%c0_11, %c0_12, %c128] : memref<1x2x384xf32, #tpu.memory_space<vmem>>, vector<1x1x128xf32>
    %21 = vector.shape_cast %20 : vector<1x1x128xf32> to vector<1x128xf32>
    %22 = vector.shape_cast %19 : vector<1x128xf32> to vector<1x1x128xf32>
    tpu.vector_store %arg4[%c0_11, %c0_12, %c128], %22 {strides = array<i32>} : memref<1x2x384xf32, #tpu.memory_space<vmem>>, vector<1x1x128xf32>,
    %c0_13 = arith.constant 0 : index
    %23 = arith.index_cast %16 : i32 to index
    %c0_14 = arith.constant 0 : index
    %24 = vector.load %arg3[%c0_13, %23, %c0_14] : memref<2x8x128xf32, #tpu.memory_space<vmem>>, vector<1x1x128xf32>
    %25 = vector.shape_cast %24 : vector<1x1x128xf32> to vector<1x128xf32>
    %c0_15 = arith.constant 0 : index
    %c0_16 = arith.constant 0 : index
    %c256 = arith.constant 256 : index
    %26 = vector.load %arg4[%c0_15, %c0_16, %c256] : memref<1x2x384xf32, #tpu.memory_space<vmem>>, vector<1x1x128xf32>
    %27 = vector.shape_cast %26 : vector<1x1x128xf32> to vector<1x128xf32>
    %28 = vector.shape_cast %25 : vector<1x128xf32> to vector<1x1x128xf32>
    tpu.vector_store %arg4[%c0_15, %c0_16, %c256], %28 {strides = array<i32>} : memref<1x2x384xf32, #tpu.memory_space<vmem>>, vector<1x1x128xf32>,
    %c1_i32 = arith.constant 1 : i32
    %29 = arith.addi %0, %c1_i32 : i32
    %30 = arith.index_cast %29 : i32 to index
    %31 = memref.load %arg1[%30] : memref<16xi32, #tpu.memory_space<smem>>
    %c0_i32_17 = arith.constant 0 : i32
    %32 = arith.maxsi %31, %c0_i32_17 : i32
    %c7_i32_18 = arith.constant 7 : i32
    %33 = arith.minsi %32, %c7_i32_18 : i32
    %c2_i32_19 = arith.constant 2 : i32
    %34 = arith.addi %0, %c2_i32_19 : i32
    %c1_i32_20 = arith.constant 1 : i32
    %35 = arith.addi %34, %c1_i32_20 : i32
    %36 = arith.index_cast %35 : i32 to index
    %37 = memref.load %arg1[%36] : memref<16xi32, #tpu.memory_space<smem>>
    %c0_i32_21 = arith.constant 0 : i32
    %38 = arith.maxsi %37, %c0_i32_21 : i32
    %c7_i32_22 = arith.constant 7 : i32
    %39 = arith.minsi %38, %c7_i32_22 : i32
    %c1 = arith.constant 1 : index
    %40 = arith.index_cast %33 : i32 to index
    %c0_23 = arith.constant 0 : index
    %41 = vector.load %arg3[%c1, %40, %c0_23] : memref<2x8x128xf32, #tpu.memory_space<vmem>>, vector<1x1x128xf32>
    %42 = vector.shape_cast %41 : vector<1x1x128xf32> to vector<1x128xf32>
    %c0_24 = arith.constant 0 : index
    %c1_25 = arith.constant 1 : index
    %c128_26 = arith.constant 128 : index
    %43 = vector.load %arg4[%c0_24, %c1_25, %c128_26] : memref<1x2x384xf32, #tpu.memory_space<vmem>>, vector<1x1x128xf32>
    %44 = vector.shape_cast %43 : vector<1x1x128xf32> to vector<1x128xf32>
    %45 = vector.shape_cast %42 : vector<1x128xf32> to vector<1x1x128xf32>
    tpu.vector_store %arg4[%c0_24, %c1_25, %c128_26], %45 {strides = array<i32>} : memref<1x2x384xf32, #tpu.memory_space<vmem>>, vector<1x1x128xf32>,
    %c1_27 = arith.constant 1 : index
    %46 = arith.index_cast %39 : i32 to index
    %c0_28 = arith.constant 0 : index
    %47 = vector.load %arg3[%c1_27, %46, %c0_28] : memref<2x8x128xf32, #tpu.memory_space<vmem>>, vector<1x1x128xf32>
    %48 = vector.shape_cast %47 : vector<1x1x128xf32> to vector<1x128xf32>
    %c0_29 = arith.constant 0 : index
    %c1_30 = arith.constant 1 : index
    %c256_31 = arith.constant 256 : index
    %49 = vector.load %arg4[%c0_29, %c1_30, %c256_31] : memref<1x2x384xf32, #tpu.memory_space<vmem>>, vector<1x1x128xf32>
    %50 = vector.shape_cast %49 : vector<1x1x128xf32> to vector<1x128xf32>
    %51 = vector.shape_cast %48 : vector<1x128xf32> to vector<1x1x128xf32>
    tpu.vector_store %arg4[%c0_29, %c1_30, %c256_31], %51 {strides = array<i32>} : memref<1x2x384xf32, #tpu.memory_space<vmem>>, vector<1x1x128xf32>,
    return
  }
  func.func @transform_0(%arg0: i32, %arg1: memref<16xi32, #tpu.memory_space<smem>>) -> (i32, i32, i32) {
    %c0_i32 = arith.constant 0 : i32
    %c0_i32_0 = arith.constant 0 : i32
    %c0_i32_1 = arith.constant 0 : i32
    return %arg0, %c0_i32, %c0_i32_0 : i32, i32, i32
  }
  func.func @transform_1(%arg0: i32, %arg1: memref<16xi32, #tpu.memory_space<smem>>) -> (i32, i32, i32) {
    %c0_i32 = arith.constant 0 : i32
    %c0_i32_0 = arith.constant 0 : i32
    %c0_i32_1 = arith.constant 0 : i32
    %c0_i32_2 = arith.constant 0 : i32
    return %c0_i32, %c0_i32_0, %c0_i32_1 : i32, i32, i32
  }
  func.func @transform_2(%arg0: i32, %arg1: memref<16xi32, #tpu.memory_space<smem>>) -> (i32, i32, i32) {
    %c0_i32 = arith.constant 0 : i32
    %c0_i32_0 = arith.constant 0 : i32
    %c0_i32_1 = arith.constant 0 : i32
    return %arg0, %c0_i32, %c0_i32_0 : i32, i32, i32
  }
}

</mosaic_0001>

<bundles_post_ra>
// kernel: tpu_custom_call.1
= control target key start
LH: loop header
LB: loop body
LE: loop exit
PB: predicated region body
PF: predicated region fallthrough
CT: control target
= control target key end

     0   :  { %s559_s12 = smov [#allocation3]   ;;  %s766_s0 = inlined_call_operand.hbm [shape: s32[16], index: 0, kind: input, shape index: {}]   ;;  %s767_s1 = inlined_call_operand.hbm [shape: f32[4,2,128], index: 1, kind: input, shape index: {}]   ;;  %s768_s2 = inlined_call_operand.hbm [shape: f32[2,8,128], index: 2, kind: input, shape index: {}]   ;;  %s769_s3 = inlined_call_operand.hbm [shape: f32[4,2,384], index: 3, kind: output, shape index: {}]  }
   0x1   :  { %9 = dma.hbm_to_smem %s766_s0, 16, %s559_s12, [#allocation2] }
   0x2   :  { %529 = dma.done.wait [#allocation2], 16 }
   0x3   :  { %530 = vsyncadd [#allocation2], 4294967280 }
   0x4   :  { %11 = sfence }
   0x5   :  { %12 = vsyncpa [#allocation5], 0 }
   0x6   :  { %14 = vsyncpa [#allocation5 + $0x1], 0 }
   0x7   :  { %15 = vsyncpa [#allocation8], 0 }
   0x8   :  { %16 = vsyncpa [#allocation6], 0 }
   0x9   :  { %18 = vsyncpa [#allocation6 + $0x1], 0  ;;  %s588_s15 = smov 0   ;;  %s590_s16 = smov 0  }
   0xa   :  { %s592_s17 = smov 0   ;;  %s594_s18 = smov 0  }
   0xb LB: > { %s609_s0 = sadd.s32 4294967295, %s557_s18   ;;  %s320_s19 = sadd.s32 4294967294, %s557_s18   ;;  %s557_s18 = sphi %s594_s18, %s790_s18   ;;  %s553_s17 = sphi %s592_s17, %s789_s17   ;;  %s549_s16 = sphi %s590_s16, %s788_s16   ;;  %s545_s15 = sphi %s588_s15, %s787_s15  }
   0xc   : > { %p44_p0 = scmp.ne.s32.totalorder %s549_s16, %s545_s15  ;;  %p770_p1 = scmp.eq.s32.totalorder %s609_s0, 0 }
   0xd   : > { %p95_p3 = scmp.eq.s32.totalorder %s320_s19, 3  ;;  %p321_p5 = scmp.ge.s32.totalorder %s557_s18, 1 }
   0xe   : > { %p618_p4 = por %p770_p1, %p44_p0  ;;  %p102_p7 = scmp.lt.s32.totalorder %s557_s18, 5 }
   0xf   : > { %p623_p6 = por %p95_p3, %p44_p0  ;;  %s560_s23 = smov [#allocation7]  }
  0x10   : > { %s774_s20 = scalar_select %p618_p4, 1, 0 }
  0x11   : > { %s775_s21 = scalar_select %p623_p6, 1, 0 }
  0x12   : > { %p628_p8 = pnand %p321_p5, %p102_p7  ;;  %s114_s24 = sshll.u32 %s560_s23, 4  ;;  %s115_s24 = int_to_ptr.vmem [resolvable:$true] %s114_s24 }
  0x13   : > { %s641_s26 = sadd.s32 1, %s557_s18   ;;  %s31_s27 = sadd.s32 1, %s553_s17 }
  0x14   : > { %s776_s22 = scalar_select %p628_p8, 1, 0 }
  0x15   : > { %p373_p9 = pneg %p628_p8  ;;  %s28_s28 = ssub.s32 %s557_s18, %s641_s26 }
  0x16   : > { %s444_s29 = scalar_lea.vmem %s115_s24, 256  ;;  %p452_p3 = scmp.lt.s32.totalorder %s115_s24, %s115_s24 }
  0x17   : > { %p636_p10 = pnand %p373_p9, %p770_p1  ;;  %p445_p12 = scmp.ne.s32.totalorder %s115_s24, %s444_s29 }
  0x18   : > { %p453_p5 = scmp.lt.s32.totalorder %s444_s29, %s444_s29 }
  0x19   : > { %p435_p11 = pneg %p636_p10 }
  0x1a   : > { %p454_p7 = por %p453_p5, %p452_p3 }
  0x1b   : > { %p447_p13 = pnand %p445_p12, %p435_p11 }
  0x1d   : > { %p448_p0 = pneg %p447_p13 }
  0x1f   : > { %p455_p2 = pnand %p454_p7, %p448_p0 }
  0x21   : > { %458 = shalt.err (!%p455_p2)
}
  0x22   : > { %s561_s30 = smov 128   ;;  %s562_s4 = smov 8  }
  0x23   : > { %376 = dma.hbm_to_vmem [thread:$0]  (!%p636_p10), %s768_s2, 256, %s115_s24, [#allocation8], %s561_s30, %s561_s30, %s562_s4  }
  0x24   : > { %p29_p9 = scmp.eq.s32.totalorder %s28_s28, 0  ;;  %p38_p11 = scmp.ne.s32.totalorder %s553_s17, %s549_s16 }
  0x25   : > { %p39_p12 = scmp.eq.s32.totalorder %s557_s18, 0  ;;  %p386_p2 = scmp.lt.s32.totalorder %s557_s18, 4 }
  0x26   : > { %s658_s7 = scalar_select %p29_p9, %s553_s17, %s31_s27  }
  0x27   : > { %p40_p13 = por %p39_p12, %p38_p11  ;;  %p778_p0 = scmp.eq.s32.totalorder %s609_s0, 3 }
  0x28   : > { %s128_s9 = sand.u32 1, %s553_s17   ;;  %s325_s10 = sshll.u32 %s557_s18, 5 }
  0x29   : > { %p662_p3 = por %p778_p0, %p38_p11  ;;  %s324_s11 = sshll.u32 %s128_s9, 1 }
  0x2a   : > { %s671_s14 = scalar_lea.hbm %s767_s1, %s325_s10  ;;  %s132_s19 = scalar_lea.vmem [#allocation4], %s324_s11 }
  0x2b   : > { %s779_s8 = scalar_select %p662_p3, 1, 0 }
  0x2c   : > { %s139_s23 = sshll.u32 %s132_s19, 4  ;;  %p673_p10 = pnand %p386_p2, %p40_p13  ;;  %s140_s23 = int_to_ptr.vmem [resolvable:$true] %s139_s23 }
  0x2d   : > { %s129_s25 = scalar_lea.sflag [#allocation5], %s128_s9  ;;  %s459_s27 = scalar_lea.hbm %s671_s14, 32 }
  0x2e   : > { %p460_p5 = scmp.ne.s32.totalorder %s671_s14, %s459_s27  ;;  %p461_p7 = pneg %p673_p10 }
  0x2f   : > { %s464_s30 = scalar_lea.hbm %s767_s1, 128  ;;  %p465_p12 = scmp.lt.s32.totalorder %s671_s14, %s767_s1 }
  0x30   : > { %p462_p9 = pnand %p461_p7, %p460_p5  ;;  %p466_p2 = scmp.lt.s32.totalorder %s464_s30, %s459_s27 }
  0x32   : > { %p463_p11 = pneg %p462_p9  ;;  %p467_p13 = por %p466_p2, %p465_p12 }
  0x34   : > { %p468_p0 = pnand %p467_p13, %p463_p11 }
  0x36   : > { %471 = shalt.err (!%p468_p0)
}
  0x37   : > { %s472_s6 = scalar_lea.vmem %s140_s23, 32  ;;  %s563_s9 = smov [#allocation4]  }
  0x38   : > { %p473_p1 = scmp.ne.s32.totalorder %s140_s23, %s472_s6  ;;  %s477_s10 = sshll.u32 %s563_s9, 4  ;;  %s478_s10 = int_to_ptr.vmem [resolvable:$false] %s477_s10 }
  0x39   : > { %s479_s11 = scalar_lea.vmem %s478_s10, 64  ;;  %p480_p5 = scmp.lt.s32.totalorder %s140_s23, %s478_s10 }
  0x3a   : > { %p475_p6 = pnand %p473_p1, %p461_p7  ;;  %p481_p9 = scmp.lt.s32.totalorder %s479_s11, %s472_s6 }
  0x3c   : > { %p476_p3 = pneg %p475_p6  ;;  %p482_p4 = por %p481_p9, %p480_p5 }
  0x3e   : > { %p483_p8 = pnand %p482_p4, %p476_p3 }
  0x40   : > { %486 = shalt.err (!%p483_p8)
}
  0x41   : > { %380 = dma.hbm_to_vmem [thread:$0]  (!%p673_p10), %s671_s14, 32, %s140_s23, %s129_s25  }
  0x42   : > { %p781_p11 = scmp.ne.s32.totalorder %s776_s22, 0 }
  0x43   : > { %s694_s12 = sand.u32 (!%p781_p11), 1, %s549_s16   ;;  %p782_p1 = scmp.ne.s32.totalorder (!%p781_p11), %s774_s20, 0 }
  0x44   : > { %148 = sbr.rel (%p781_p11) target bundleno = 116 (0x74), region = 28  ;;  %s327_s13 = sshll.u32 (!%p781_p11), %s694_s12, 1 }
  0x45   : > { %s151_s19 = scalar_lea.sflag (!%p781_p11), [#allocation5], %s694_s12  ;;  %s154_s27 = scalar_lea.vmem (!%p781_p11), [#allocation4], %s327_s13 }
  0x49   : > { %532 = dma.done.wait (%p782_p1), %s151_s19, 32  }
  0x4a   : > { %534 = vsyncadd (%p782_p1), %s151_s19, 4294967264  ;;  %p783_p4 = scmp.eq.s32.totalorder %s609_s0, 0 }
  0x4c   : > { %536 = dma.done.wait (%p783_p4), [#allocation8], 256   ;;  %p784_p6 = pmov %p783_p4 }
  0x4d   : > { %s363_s22 = smul.u32 6, %s694_s12  ;;  %s329_s14 = sshll.u32 %s609_s0, 2  ;;  %v180_v0 = vld [vmem:[%s154_s27] sm:$0x3] }
  0x4e   : > { %538 = vsyncadd (%p784_p6), [#allocation8], 4294967040  ;;  %s182_s23 = sld [smem:[#allocation3 + %s329_s14]]  ;;  %s187_s24 = sadd.s32 2, %s329_s14 }
  0x4f   : > { %s188_s25 = sld [smem:[#allocation3 + %s187_s24]]  ;;  %s199_s28 = sadd.s32 1, %s329_s14 }
  0x50   : > { %s708_s29 = scalar_lea.vmem [#allocation9], %s363_s22  ;;  %s200_s30 = sld [smem:[#allocation3 + %s199_s28]] }
  0x51   : > { %s234_s20 = sshll.u32 %s708_s29, 4  ;;  %s205_s4 = sadd.s32 3, %s329_s14  ;;  %181 = vst [vmem:[%s708_s29] sm:$0x3] %v180_v0  ;;  %s717_s20 = int_to_ptr.vmem [resolvable:$true] %s234_s20 }
  0x52   : > { %s206_s5 = sld [smem:[#allocation3 + %s205_s4]]  ;;  %s364_s6 = smul.u32 96, %s609_s0 }
  0x53   : > { %s220_s14 = scalar_lea.sflag [#allocation6], %s694_s12  ;;  %p785_p9 = scmp.ne.s32.totalorder %s779_s8, 0 }
  0x54   : > { %p183_p8 = scmp.gt.s32.totalorder %s182_s23, 0  ;;  %p330_p3 = scmp.lt.s32.totalorder %s182_s23, 7 }
  0x55   : > { %p189_p10 = scmp.gt.s32.totalorder %s188_s25, 0  ;;  %p335_p7 = scmp.lt.s32.totalorder %s188_s25, 7 }
  0x56   : > { %s792_s23 = smov (!%p183_p8, %s182_s23), 0  ;;  %p201_p12 = scmp.gt.s32.totalorder %s200_s30, 0 }
  0x57   : > { %s794_s25 = smov (!%p189_p10, %s188_s25), 0  ;;  %s796_s23 = smov (!%p330_p3, %s792_s23), 7 }
  0x58   : > { %s798_s25 = smov (!%p335_p7, %s794_s25), 7  ;;  %s193_s9 = scalar_lea.vmem [#allocation7], %s796_s23 }
  0x59   : > { %v194_v1 = vld [vmem:[%s193_s9] sm:$0x1]  ;;  %p340_p2 = scmp.lt.s32.totalorder %s200_s30, 7  ;;  %s196_s10 = scalar_lea.vmem [#allocation7], %s798_s25 }
  0x5a   : > { %195 = vst [vmem:[%s708_s29 + $0x2] sm:$0x1] %v194_v1  ;;  %v197_v2 = vld [vmem:[%s196_s10] sm:$0x1]  ;;  %s800_s30 = smov (!%p201_p12, %s200_s30), 0  ;;  %p207_p13 = scmp.gt.s32.totalorder %s206_s5, 0 }
  0x5b   : > { %198 = vst [vmem:[%s708_s29 + $0x4] sm:$0x1] %v197_v2  ;;  %p345_p0 = scmp.lt.s32.totalorder %s206_s5, 7  ;;  %s802_s30 = smov (!%p340_p2, %s800_s30), 7 }
  0x5c   : > { %s804_s5 = smov (!%p207_p13, %s206_s5), 0  ;;  %s275_s11 = scalar_lea.vmem [#allocation7], %s802_s30 }
  0x5d   : > { %v350_v3 = vld [vmem:[%s275_s11 + $0x8] sm:$0x1]  ;;  %s806_s5 = smov (!%p345_p0, %s804_s5), 7  ;;  %s725_s27 = scalar_lea.hbm %s769_s3, %s364_s6 }
  0x5e   : > { %214 = vst [vmem:[%s708_s29 + $0x3] sm:$0x1] %v350_v3  ;;  %s277_s22 = scalar_lea.vmem [#allocation7], %s806_s5  ;;  %s487_s23 = scalar_lea.vmem %s717_s20, 96 }
  0x5f   : > { %v351_v4 = vld [vmem:[%s277_s22 + $0x8] sm:$0x1]  ;;  %p488_p5 = scmp.ne.s32.totalorder %s717_s20, %s487_s23  ;;  %s564_s24 = smov [#allocation9]  }
  0x60   : > { %218 = vst [vmem:[%s708_s29 + $0x5] sm:$0x1] %v351_v4  ;;  %s491_s25 = sshll.u32 %s564_s24, 4  ;;  %s492_s25 = int_to_ptr.vmem [resolvable:$false] %s491_s25 }
  0x61   : > { %p489_p11 = pnand %p488_p5, %p785_p9  ;;  %s493_s28 = scalar_lea.vmem %s492_s25, 192 }
  0x62   : > { %p494_p4 = scmp.lt.s32.totalorder %s717_s20, %s492_s25  ;;  %p495_p6 = scmp.lt.s32.totalorder %s493_s28, %s487_s23 }
  0x63   : > { %p490_p1 = pneg %p489_p11 }
  0x64   : > { %p496_p8 = por %p495_p6, %p494_p4 }
  0x66   : > { %p497_p3 = pnand %p496_p8, %p490_p1 }
  0x68   : > { %500 = shalt.err (!%p497_p3)
}
  0x69   : > { %s501_s0 = scalar_lea.hbm %s725_s27, 96  ;;  %s505_s30 = scalar_lea.hbm %s769_s3, 384 }
  0x6a   : > { %p502_p10 = scmp.ne.s32.totalorder %s725_s27, %s501_s0  ;;  %p506_p2 = scmp.lt.s32.totalorder %s725_s27, %s769_s3 }
  0x6b   : > { %p507_p13 = scmp.lt.s32.totalorder %s505_s30, %s501_s0 }
  0x6c   : > { %p503_p7 = pnand %p502_p10, %p785_p9 }
  0x6d   : > { %p508_p0 = por %p507_p13, %p506_p2 }
  0x6e   : > { %p504_p12 = pneg %p503_p7 }
  0x70   : > { %p509_p5 = pnand %p508_p0, %p504_p12 }
  0x72   : > { %512 = shalt.err (!%p509_p5)
}
  0x73   : > { %371 = dma.vmem_to_hbm [thread:$0]  (%p785_p9), %s717_s20, 96, %s725_s27, %s220_s14  }
  0x74 PF: > { %p388_p11 = scmp.ge.s32.totalorder %s557_s18, 2  ;;  %s246_s6 = sand.u32 1, %s545_s15  }
  0x75   : > { %p786_p1 = scmp.ne.s32.totalorder %s775_s21, 0  ;;  %s247_s9 = scalar_lea.sflag [#allocation6], %s246_s6 }
  0x77   : > { %p382_p4 = pnand %p388_p11, %p786_p1 }
  0x79   : > { %p383_p6 = pneg %p382_p4 }
  0x7b   : > { %540 = dma.done.wait (%p383_p6), %s247_s9, 96  }
  0x7c   : > { %542 = vsyncadd (%p383_p6), %s247_s9, 4294967200  ;;  %p21_p8 = scmp.ge.s32.totalorder %s641_s26, 6   ;;  %s787_s15 = smov %s549_s16 }
  0x7d   : > { %s788_s16 = smov %s553_s17  ;;  %s789_s17 = smov %s658_s7 }
  0x7e   : > { %s790_s18 = smov %s641_s26  ;;  %23 = sbr.rel (!%p21_p8) target bundleno = 11 (0xb), region = 81 }
  0x83   :  { %252 = vsyncpa [#allocation5], 1 }
  0x84   :  { %254 = vsyncpa [#allocation5 + $0x1], 1 }
  0x85   :  { %255 = vsyncpa [#allocation8], 1 }
  0x86   :  { %256 = vsyncpa [#allocation6], 1 }
  0x87   :  { %258 = vsyncpa [#allocation6 + $0x1], 1 }

</bundles_post_ra>
